<compile_context>
chip_gen: v6e
topology: v6e:2x2x1
jax: 0.10.0
libtpu: 0.0.40
codegen_flags: <defaults>
</compile_context>

<pallas_src>
import math
import functools

import jax
import jax.numpy as jnp
from jax import lax
from jax.experimental import pallas as pl
from jax.experimental.pallas import tpu as pltpu

_INV_SQRT2 = 1.0 / math.sqrt(2.0)


def _gelu_exact(h):
    # Exact (erf-based) GELU in f32 — matches torch.nn.GELU's default.
    # TODO(synk): on VALU-bound shapes (v6e/v7x, medium indim) a tanh-approx
    # or bf16 GELU moves this polynomial off the VALU, at a small numerics delta.
    return 0.5 * h * (1.0 + lax.erf(h * _INV_SQRT2))


def _mlp_kernel_out_acc(x_ref, w1_ref, b1_ref, w2_ref, b2_ref, o_ref):
    """f32 output: accumulate fc2 partials directly into the resident o_ref."""
    k = pl.program_id(1)

    @pl.when(k == 0)
    def _init():
        # Fold the fc2 bias into the accumulator init (no per-step bias add).
        o_ref[...] = jnp.broadcast_to(
            b2_ref[...].astype(jnp.float32), o_ref.shape)

    h = jnp.dot(x_ref[...], w1_ref[...], preferred_element_type=jnp.float32)
    h = _gelu_exact(h + b1_ref[...].astype(jnp.float32))
    o_ref[...] += jnp.dot(h.astype(w2_ref.dtype), w2_ref[...],
                          preferred_element_type=jnp.float32)


def _mlp_kernel_scratch_acc(x_ref, w1_ref, b1_ref, w2_ref, b2_ref, o_ref,
                            acc_ref):
    """Non-f32 output: accumulate in an f32 VMEM scratch, cast at the end."""
    k = pl.program_id(1)

    @pl.when(k == 0)
    def _init():
        acc_ref[...] = jnp.broadcast_to(
            b2_ref[...].astype(jnp.float32), acc_ref.shape)

    h = jnp.dot(x_ref[...], w1_ref[...], preferred_element_type=jnp.float32)
    h = _gelu_exact(h + b1_ref[...].astype(jnp.float32))
    acc_ref[...] += jnp.dot(h.astype(w2_ref.dtype), w2_ref[...],
                            preferred_element_type=jnp.float32)

    @pl.when(k == pl.num_programs(1) - 1)
    def _finalize():
        o_ref[...] = acc_ref[...].astype(o_ref.dtype)


def _round_up(n, m):
    return ((n + m - 1) // m) * m


def _vmem_capacity_bytes():
    """Per-TensorCore VMEM capacity; conservative 64 MiB (v7x) if unknown."""
    try:
        cap = int(pltpu.get_tpu_info().vmem_capacity_bytes)
        if cap > 0:
            return min(cap, 128 << 20)
    except Exception:
        pass
    return 64 << 20


def _sublane_multiple(dtype):
    item = jnp.dtype(dtype).itemsize
    return max(8, 32 // max(item, 1))   # 8 (f32), 16 (bf16/f16), 32 (i8/fp8)


def _pick_tiles(tokens, indim_p, hidden_p, x_dtype, w_dtype, out_dtype,
                tm_req, vmem_budget):
    """Choose (tm, th) so the pipelined working set fits the VMEM budget.

    Prefers th == full padded hidden so W1/W2 block indices are constant and
    the weights are DMA'd from HBM exactly once (resident across token tiles).
    The streamed fallback only uses th that divide the 128-aligned hidden dim,
    so pre-padded weights never need per-call re-padding.
    """
    in_item = jnp.dtype(x_dtype).itemsize
    w_item = jnp.dtype(w_dtype).itemsize
    out_item = jnp.dtype(out_dtype).itemsize
    use_scratch = jnp.dtype(out_dtype) != jnp.dtype(jnp.float32)
    sub = _sublane_multiple(x_dtype)

    def vmem_bytes(tm, th):
        b = 2 * tm * indim_p * (in_item + out_item)   # x / out, double-buffered
        b += 4 * indim_p * th * w_item                # W1 + W2, double-buffered
        b += tm * th * 4                              # fc1 activations (f32)
        if use_scratch:
            b += tm * indim_p * 4                     # f32 accumulator scratch
        b += 2 * (th + indim_p) * max(w_item, 4)      # biases
        b += 2 << 20                                  # slack / compiler scratch
        return b

    def tm_start():
        return _round_up(min(max(tm_req, sub), _round_up(tokens, sub)), sub)

    # 1) weights fully resident (constant W1/W2 block index).
    tm = tm_start()
    tm_floor = min(tm, 128)
    th = hidden_p
    while vmem_bytes(tm, th) > vmem_budget and tm > tm_floor:
        tm = max(tm_floor, (tm // 2 // sub) * sub)
    if vmem_bytes(tm, th) <= vmem_budget:
        return tm, th

    # 2) stream the hidden (reduction) axis; th must divide hidden_p.
    tm = tm_start()
    n128 = hidden_p // 128
    th = 128
    for d in range(n128, 0, -1):
        if n128 % d == 0 and vmem_bytes(tm, 128 * d) <= vmem_budget:
            th = 128 * d
            break
    while vmem_bytes(tm, th) > vmem_budget and tm > sub:
        tm = max(sub, (tm // 2 // sub) * sub)
    return tm, th


def prepare_mlp_params(w1, b1, w2, b2):
    """One-time parameter layout: pad feature dims to multiples of 128.

    Zero padding is exact for Linear -> GELU -> Linear (padded hidden columns
    produce GELU(0) = 0 which multiplies zero W2 rows).  Call once at init so
    the per-call forward does no padding work on the weights.
    """
    indim, hidden = w1.shape
    indim_p = _round_up(indim, 128)
    hidden_p = _round_up(hidden, 128)
    b1 = jnp.asarray(b1).reshape(1, hidden)
    b2 = jnp.asarray(b2).reshape(1, indim)
    if (indim_p, hidden_p) != (indim, hidden):
        w1 = jnp.zeros((indim_p, hidden_p), w1.dtype).at[:indim, :hidden].set(w1)
        b1 = jnp.zeros((1, hidden_p), b1.dtype).at[:, :hidden].set(b1)
        w2 = jnp.zeros((hidden_p, indim_p), w2.dtype).at[:hidden, :indim].set(w2)
        b2 = jnp.zeros((1, indim_p), b2.dtype).at[:, :indim].set(b2)
    return w1, b1, w2, b2


@functools.partial(jax.jit, static_argnames=("tm",))
def mlp_forward(x, w1, b1, w2, b2, *, tm=512):
    """MLP(x) = GELU(x @ W1 + b1) @ W2 + b2, applied along the last axis of x.

    Accepts either raw ([indim, hidden], ...) or prepare_mlp_params()-padded
    parameters; padding is skipped whenever shapes are already aligned.
    """
    indim = x.shape[-1]
    lead = x.shape[:-1]
    tokens = math.prod(lead)
    x2d = x.reshape(tokens, indim)

    indim_w, hidden_w = w1.shape
    assert indim_w >= indim, "weight indim smaller than x feature dim"
    indim_p = _round_up(indim_w, 128)
    hidden_p = _round_up(hidden_w, 128)

    out_dtype = x.dtype
    vmem_cap = _vmem_capacity_bytes()
    vmem_budget = (vmem_cap * 3) // 4            # headroom for spills/scratch
    tm, th = _pick_tiles(tokens, indim_p, hidden_p, x.dtype, w1.dtype,
                         out_dtype, tm, vmem_budget)
    tokens_p = _round_up(tokens, tm)

    # --- pad only when actually misaligned (hoist weight padding to
    #     prepare_mlp_params for zero per-call cost) --------------------------
    if w1.shape != (indim_p, hidden_p):
        w1 = jnp.zeros((indim_p, hidden_p), w1.dtype).at[:indim_w, :hidden_w].set(w1)
    if w2.shape != (hidden_p, indim_p):
        w2 = jnp.zeros((hidden_p, indim_p), w2.dtype).at[:hidden_w, :indim_w].set(w2)
    b1 = b1.reshape(1, -1)
    b2 = b2.reshape(1, -1)
    if b1.shape != (1, hidden_p):
        b1 = jnp.zeros((1, hidden_p), b1.dtype).at[:, :b1.shape[1]].set(b1)
    if b2.shape != (1, indim_p):
        b2 = jnp.zeros((1, indim_p), b2.dtype).at[:, :b2.shape[1]].set(b2)
    if x2d.shape != (tokens_p, indim_p):
        x2d = jnp.zeros((tokens_p, indim_p), x.dtype).at[:tokens, :indim].set(x2d)

    grid = (tokens_p // tm, hidden_p // th)
    out_is_f32 = jnp.dtype(out_dtype) == jnp.dtype(jnp.float32)

    in_specs = [
        pl.BlockSpec((tm, indim_p), lambda i, k: (i, 0)),   # x tile
        pl.BlockSpec((indim_p, th), lambda i, k: (0, k)),   # W1 (resident if th==hidden_p)
        pl.BlockSpec((1, th),       lambda i, k: (0, k)),   # b1
        pl.BlockSpec((th, indim_p), lambda i, k: (k, 0)),   # W2 (resident if th==hidden_p)
        pl.BlockSpec((1, indim_p),  lambda i, k: (0, 0)),   # b2 (resident)
    ]
    out_spec = pl.BlockSpec((tm, indim_p), lambda i, k: (i, 0))

    w_item = jnp.dtype(w1.dtype).itemsize
    cost = pl.CostEstimate(
        flops=4 * tokens_p * indim_p * hidden_p,
        transcendentals=tokens_p * hidden_p,
        bytes_accessed=(x2d.size * x2d.dtype.itemsize
                        + (w1.size + w2.size + b1.size + b2.size) * w_item
                        + tokens_p * indim_p * jnp.dtype(out_dtype).itemsize),
    )

    kernel = _mlp_kernel_out_acc if out_is_f32 else _mlp_kernel_scratch_acc
    scratch = [] if out_is_f32 else [pltpu.VMEM((tm, indim_p), jnp.float32)]

    out_p = pl.pallas_call(
        kernel,
        out_shape=jax.ShapeDtypeStruct((tokens_p, indim_p), out_dtype),
        grid_spec=pltpu.PrefetchScalarGridSpec(
            num_scalar_prefetch=0,
            grid=grid,
            in_specs=in_specs,
            out_specs=out_spec,
            scratch_shapes=scratch,
        ),
        compiler_params=pltpu.CompilerParams(
            # token tiles independent -> "parallel" (megacore sharding);
            # hidden is a reduction into the resident output/acc -> "arbitrary".
            dimension_semantics=("parallel", "arbitrary"),
            vmem_limit_bytes=min(vmem_cap - (8 << 20), 112 << 20),
        ),
        cost_estimate=cost,
    )(x2d, w1, b1, w2, b2)

    out = out_p
    if (tokens_p, indim_p) != (tokens, indim):
        out = out_p[:tokens, :indim]
    return out.reshape(*lead, indim)


def init_mlp_params(key, indim, hidden, dtype=jnp.float32):
    """Deterministic init mimicking torch.nn.Linear (uniform +-1/sqrt(fan_in)).

    Weights are stored transposed relative to torch ([in, out]) so the kernel
    computes x @ W directly.
    """
    k1, k2, k3, k4 = jax.random.split(key, 4)
    bound1 = 1.0 / math.sqrt(indim)
    bound2 = 1.0 / math.sqrt(hidden)
    w1 = jax.random.uniform(k1, (indim, hidden), dtype, -bound1, bound1)
    b1 = jax.random.uniform(k2, (1, hidden), dtype, -bound1, bound1)
    w2 = jax.random.uniform(k3, (hidden, indim), dtype, -bound2, bound2)
    b2 = jax.random.uniform(k4, (1, indim), dtype, -bound2, bound2)
    return w1, b1, w2, b2


def _reference(x, w1, b1, w2, b2):
    h = x @ w1 + b1
    h = 0.5 * h * (1.0 + lax.erf(h * _INV_SQRT2))
    return h @ w2 + b2


if __name__ == "__main__":
    indim, hidden = 32, 64
    batch, seq = 2, 8

    key = jax.random.PRNGKey(0)
    kx, kp = jax.random.split(key)
    x = jax.random.normal(kx, (batch, seq, indim), jnp.float32)
    w1, b1, w2, b2 = init_mlp_params(kp, indim, hidden)

    # One-time layout (hoisted weight padding); forward also accepts raw params.
    pw1, pb1, pw2, pb2 = prepare_mlp_params(w1, b1, w2, b2)

    out = jax.block_until_ready(mlp_forward(x, pw1, pb1, pw2, pb2))

    ref = _reference(x.reshape(-1, indim), w1, b1, w2, b2).reshape(out.shape)
    assert out.shape == x.shape
    assert jnp.allclose(out, ref, atol=2e-5, rtol=2e-5), "mismatch vs reference"

    print("KERNEL_OK")
</pallas_src>

<mosaic_0001>
module attributes {stable_mosaic.version = 11 : i64} {
  func.func @_mlp_kernel_out_acc(%arg0: i32, %arg1: i32, %arg2: memref<16x128xf32, #tpu.memory_space<vmem>>, %arg3: memref<128x128xf32, #tpu.memory_space<vmem>>, %arg4: memref<1x128xf32, #tpu.memory_space<vmem>>, %arg5: memref<128x128xf32, #tpu.memory_space<vmem>>, %arg6: memref<1x128xf32, #tpu.memory_space<vmem>>, %arg7: memref<16x128xf32, #tpu.memory_space<vmem>>) attributes {dimension_semantics = [#tpu.dimension_semantics<parallel>, #tpu.dimension_semantics<arbitrary>], iteration_bounds = array<i64: 1, 1>, scalar_prefetch = 0 : i64, scratch_operands = 0 : i64, tpu.core_type = #tpu.core_type<tc>, window_params = [{transform_indices = @transform_0, window_bounds = array<i64: 16, 128>}, {transform_indices = @transform_1, window_bounds = array<i64: 128, 128>}, {transform_indices = @transform_2, window_bounds = array<i64: 1, 128>}, {transform_indices = @transform_3, window_bounds = array<i64: 128, 128>}, {pipeline_mode = #tpu.pipeline_mode<synchronous>, transform_indices = @transform_4, window_bounds = array<i64: 1, 128>}, {transform_indices = @transform_5, window_bounds = array<i64: 16, 128>}]} {
    %c0_i32 = arith.constant 0 : i32
    %0 = arith.cmpi eq, %arg1, %c0_i32 : i32
    %1 = arith.extui %0 : i1 to i32
    %c0_i32_0 = arith.constant 0 : i32
    %2 = arith.cmpi ne, %1, %c0_i32_0 : i32
    scf.if %2 {
      %c0_16 = arith.constant 0 : index
      %c0_17 = arith.constant 0 : index
      %22 = vector.load %arg6[%c0_16, %c0_17] : memref<1x128xf32, #tpu.memory_space<vmem>>, vector<1x128xf32>
      %23 = vector.shape_cast %22 : vector<1x128xf32> to vector<1x128xf32>
      %24 = vector.broadcast %23 : vector<1x128xf32> to vector<16x128xf32>
      %c0_18 = arith.constant 0 : index
      %c0_19 = arith.constant 0 : index
      %25 = vector.load %arg7[%c0_18, %c0_19] : memref<16x128xf32, #tpu.memory_space<vmem>>, vector<16x128xf32>
      tpu.vector_store %arg7[%c0_18, %c0_19], %24 {strides = array<i32>} : memref<16x128xf32, #tpu.memory_space<vmem>>, vector<16x128xf32>,
    } else {
    }
    %c0 = arith.constant 0 : index
    %c0_1 = arith.constant 0 : index
    %3 = vector.load %arg2[%c0, %c0_1] : memref<16x128xf32, #tpu.memory_space<vmem>>, vector<16x128xf32>
    %c0_2 = arith.constant 0 : index
    %c0_3 = arith.constant 0 : index
    %4 = vector.load %arg3[%c0_2, %c0_3] : memref<128x128xf32, #tpu.memory_space<vmem>>, vector<128x128xf32>
    %cst = arith.constant dense<0.000000e+00> : vector<16x128xf32>
    %5 = tpu.matmul %3, %4, %cst {dimension_numbers = #tpu.dot_dimension_numbers<[1], [0], [0], [1], [0, 0, 1, 1], [], []>} : vector<16x128xf32>, vector<128x128xf32>, vector<16x128xf32> -> vector<16x128xf32>
    %c0_4 = arith.constant 0 : index
    %c0_5 = arith.constant 0 : index
    %6 = vector.load %arg4[%c0_4, %c0_5] : memref<1x128xf32, #tpu.memory_space<vmem>>, vector<1x128xf32>
    %7 = vector.broadcast %6 : vector<1x128xf32> to vector<16x128xf32>
    %8 = arith.addf %5, %7 : vector<16x128xf32>
    %cst_6 = arith.constant 5.000000e-01 : f32
    %9 = vector.broadcast %cst_6 : f32 to vector<16x128xf32>
    %10 = arith.mulf %9, %8 : vector<16x128xf32>
    %cst_7 = arith.constant 0.707106769 : f32
    %11 = vector.broadcast %cst_7 : f32 to vector<16x128xf32>
    %12 = arith.mulf %8, %11 : vector<16x128xf32>
    %13 = math.erf %12 : vector<16x128xf32>
    %cst_8 = arith.constant 1.000000e+00 : f32
    %14 = vector.broadcast %cst_8 : f32 to vector<16x128xf32>
    %15 = arith.addf %14, %13 : vector<16x128xf32>
    %16 = arith.mulf %10, %15 : vector<16x128xf32>
    %c0_9 = arith.constant 0 : index
    %c0_10 = arith.constant 0 : index
    %17 = vector.load %arg7[%c0_9, %c0_10] : memref<16x128xf32, #tpu.memory_space<vmem>>, vector<16x128xf32>
    %c0_11 = arith.constant 0 : index
    %c0_12 = arith.constant 0 : index
    %18 = vector.load %arg5[%c0_11, %c0_12] : memref<128x128xf32, #tpu.memory_space<vmem>>, vector<128x128xf32>
    %cst_13 = arith.constant dense<0.000000e+00> : vector<16x128xf32>
    %19 = tpu.matmul %16, %18, %cst_13 {dimension_numbers = #tpu.dot_dimension_numbers<[1], [0], [0], [1], [0, 0, 1, 1], [], []>} : vector<16x128xf32>, vector<128x128xf32>, vector<16x128xf32> -> vector<16x128xf32>
    %20 = arith.addf %17, %19 : vector<16x128xf32>
    %c0_14 = arith.constant 0 : index
    %c0_15 = arith.constant 0 : index
    %21 = vector.load %arg7[%c0_14, %c0_15] : memref<16x128xf32, #tpu.memory_space<vmem>>, vector<16x128xf32>
    tpu.vector_store %arg7[%c0_14, %c0_15], %20 {strides = array<i32>} : memref<16x128xf32, #tpu.memory_space<vmem>>, vector<16x128xf32>,
    return
  }
  func.func @transform_0(%arg0: i32, %arg1: i32) -> (i32, i32) {
    %c0_i32 = arith.constant 0 : i32
    %c0_i32_0 = arith.constant 0 : i32
    return %arg0, %c0_i32 : i32, i32
  }
  func.func @transform_1(%arg0: i32, %arg1: i32) -> (i32, i32) {
    %c0_i32 = arith.constant 0 : i32
    %c0_i32_0 = arith.constant 0 : i32
    return %c0_i32, %arg1 : i32, i32
  }
  func.func @transform_2(%arg0: i32, %arg1: i32) -> (i32, i32) {
    %c0_i32 = arith.constant 0 : i32
    %c0_i32_0 = arith.constant 0 : i32
    return %c0_i32, %arg1 : i32, i32
  }
  func.func @transform_3(%arg0: i32, %arg1: i32) -> (i32, i32) {
    %c0_i32 = arith.constant 0 : i32
    %c0_i32_0 = arith.constant 0 : i32
    return %arg1, %c0_i32 : i32, i32
  }
  func.func @transform_4(%arg0: i32, %arg1: i32) -> (i32, i32) {
    %c0_i32 = arith.constant 0 : i32
    %c0_i32_0 = arith.constant 0 : i32
    %c0_i32_1 = arith.constant 0 : i32
    return %c0_i32, %c0_i32_0 : i32, i32
  }
  func.func @transform_5(%arg0: i32, %arg1: i32) -> (i32, i32) {
    %c0_i32 = arith.constant 0 : i32
    %c0_i32_0 = arith.constant 0 : i32
    return %arg0, %c0_i32 : i32, i32
  }
}

</mosaic_0001>

<bundles_post_ra>
// kernel: mlp_forward.1
= control target key start
LH: loop header
LB: loop body
LE: loop exit
PB: predicated region body
PF: predicated region fallthrough
CT: control target
= control target key end

     0   :  { %10 = vsyncpa [#allocation3], 0  ;;  %s492_s0 = inlined_call_operand.vmem [shape: f32[16,128], index: 0, kind: input, shape index: {}]   ;;  %s493_s1 = inlined_call_operand.hbm [shape: f32[128,128], index: 1, kind: input, shape index: {}]   ;;  %s494_s2 = inlined_call_operand.vmem [shape: f32[1,128], index: 2, kind: input, shape index: {}]   ;;  %s495_s3 = inlined_call_operand.hbm [shape: f32[128,128], index: 3, kind: input, shape index: {}]   ;;  %s496_s4 = inlined_call_operand.vmem [shape: f32[1,128], index: 4, kind: input, shape index: {}]   ;;  %s497_s5 = inlined_call_operand.vmem [shape: f32[16,128], index: 5, kind: output, shape index: {}]  }
   0x1   :  { %11 = vsyncpa [#allocation5], 0  ;;  %s434_s18 = smov [#allocation2]  }
   0x2   :  { %s19_s19 = sshll.u32 %s434_s18, 4  ;;  %s20_s19 = int_to_ptr.vmem [resolvable:$true] %s19_s19 }
   0x3   :  { %s398_s20 = scalar_lea.vmem %s20_s19, 2048  ;;  %p403_p1 = scmp.lt.s32.totalorder %s20_s19, %s20_s19 }
   0x4   :  { %p399_p0 = scmp.ne.s32.totalorder %s20_s19, %s398_s20  ;;  %p404_p2 = scmp.lt.s32.totalorder %s398_s20, %s398_s20 }
   0x6   :  { %p405_p3 = por %p404_p2, %p403_p1 }
   0x8   :  { %p406_p4 = pnand %p405_p3, %p399_p0 }
   0xa   :  { %409 = shalt.err (!%p406_p4)
}
   0xb   :  { %s435_s21 = smov 128   ;;  %s436_s22 = smov 8  }
   0xc   :  { %25 = dma.hbm_to_vmem [thread:$0]  %s493_s1, 2048, %s20_s19, [#allocation3], %s435_s21, %s435_s21, %s436_s22  }
   0xd   :  { %s437_s25 = smov [#allocation4]  }
   0xe   :  { %s33_s26 = sshll.u32 %s437_s25, 4  ;;  %s34_s26 = int_to_ptr.vmem [resolvable:$true] %s33_s26 }
   0xf   :  { %s418_s27 = scalar_lea.vmem %s34_s26, 2048  ;;  %p423_p6 = scmp.lt.s32.totalorder %s34_s26, %s34_s26 }
  0x10   :  { %p419_p5 = scmp.ne.s32.totalorder %s34_s26, %s418_s27  ;;  %p424_p7 = scmp.lt.s32.totalorder %s418_s27, %s418_s27 }
  0x12   :  { %p425_p8 = por %p424_p7, %p423_p6 }
  0x14   :  { %p426_p9 = pnand %p425_p8, %p419_p5 }
  0x16   :  { %429 = shalt.err (!%p426_p9)
}
  0x17   :  { %39 = dma.hbm_to_vmem [thread:$0]  %s495_s3, 2048, %s34_s26, [#allocation5], %s435_s21, %s435_s21, %s436_s22  }
  0x18   :  { %430 = dma.done.wait [#allocation3], 2048  }
  0x19   :  { %431 = vsyncadd [#allocation3], 4294965248 }
  0x1a   :  { %432 = dma.done.wait [#allocation5], 2048  }
  0x1b   :  { %433 = vsyncadd [#allocation5], 4294965248  ;;  %v78_v0 = vld [vmem:[#allocation2 + $0x78] sm:$0xff]  ;;  %v77_v1 = vld [vmem:[#allocation2 + $0x70] sm:$0xff] }
  0x1c   :  { %312 = vmatprep.subr.mxu0 %v78_v0  ;;  %v76_v2 = vld [vmem:[#allocation2 + $0x68] sm:$0xff]  ;;  %v75_v3 = vld [vmem:[#allocation2 + $0x60] sm:$0xff]  ;;  %v74_v5 = vld [vmem:[#allocation2 + $0x58] sm:$0xff] }
  0x1d   :  { %313 = vmatpush3.msra.mxu0 %v78_v0  ;;  %v61_v4 = vld [vmem:[%s492_s0] sm:$0xff]  ;;  %v188_v6 = vld [vmem:[#allocation4 + $0x78] sm:$0xff]  ;;  %v187_v7 = vld [vmem:[#allocation4 + $0x70] sm:$0xff] }
  0x1e   :  { %314 = vmatprep.subr.mxu0 %v77_v1  ;;  %344 = vmatprep.mubr.f32.mxu0 %v61_v4  ;;  %v73_v8 = vld [vmem:[#allocation2 + $0x50] sm:$0xff]  ;;  %v186_v9 = vld [vmem:[#allocation4 + $0x68] sm:$0xff]  ;;  %v71_v11 = vld [vmem:[#allocation2 + $0x40] sm:$0xff] }
  0x1f   :  { %315 = vmatpush3.msra.mxu0 %v77_v1  ;;  %347 = vmatprep.subr.mxu1 %v188_v6  ;;  %v72_v10 = vld [vmem:[#allocation2 + $0x48] sm:$0xff]  ;;  %v70_v12 = vld [vmem:[#allocation2 + $0x38] sm:$0xff]  ;;  %v69_v13 = vld [vmem:[#allocation2 + $0x30] sm:$0xff] }
  0x20   :  { %316 = vmatprep.subr.mxu0 %v76_v2  ;;  %348 = vmatpush3.msra.mxu1 %v188_v6  ;;  %v68_v14 = vld [vmem:[#allocation2 + $0x28] sm:$0xff]  ;;  %v67_v15 = vld [vmem:[#allocation2 + $0x20] sm:$0xff]  ;;  %v66_v16 = vld [vmem:[#allocation2 + $0x18] sm:$0xff] }
  0x21   :  { %317 = vmatpush3.msra.mxu0 %v76_v2  ;;  %349 = vmatprep.subr.mxu1 %v187_v7  ;;  %v65_v17 = vld [vmem:[#allocation2 + $0x10] sm:$0xff]  ;;  %v64_v18 = vld [vmem:[#allocation2 + $0x8] sm:$0xff]  ;;  %v63_v19 = vld [vmem:[#allocation2] sm:$0xff] }
  0x22   :  { %318 = vmatprep.subr.mxu0 %v75_v3  ;;  %350 = vmatpush3.msra.mxu1 %v187_v7  ;;  %v62_v20 = vld [vmem:[%s492_s0 + $0x8] sm:$0xff]  ;;  %v185_v21 = vld [vmem:[#allocation4 + $0x60] sm:$0xff]  ;;  %v184_v22 = vld [vmem:[#allocation4 + $0x58] sm:$0xff] }
  0x23   :  { %319 = vmatpush3.msra.mxu0 %v75_v3  ;;  %351 = vmatprep.subr.mxu1 %v186_v9  ;;  %v183_v23 = vld [vmem:[#allocation4 + $0x50] sm:$0xff]  ;;  %v182_v24 = vld [vmem:[#allocation4 + $0x48] sm:$0xff]  ;;  %v181_v25 = vld [vmem:[#allocation4 + $0x40] sm:$0xff] }
  0x24   :  { %320 = vmatprep.subr.mxu0 %v74_v5  ;;  %352 = vmatpush3.msra.mxu1 %v186_v9  ;;  %v180_v26 = vld [vmem:[#allocation4 + $0x38] sm:$0xff]  ;;  %v179_v27 = vld [vmem:[#allocation4 + $0x30] sm:$0xff]  ;;  %v178_v28 = vld [vmem:[#allocation4 + $0x28] sm:$0xff] }
  0x25   :  { %321 = vmatpush3.msra.mxu0 %v74_v5  ;;  %353 = vmatprep.subr.mxu1 %v185_v21  ;;  %v177_v29 = vld [vmem:[#allocation4 + $0x20] sm:$0xff]  ;;  %v176_v30 = vld [vmem:[#allocation4 + $0x18] sm:$0xff]  ;;  %v175_v31 = vld [vmem:[#allocation4 + $0x10] sm:$0xff] }
  0x26   :  { %322 = vmatprep.subr.mxu0 %v73_v8  ;;  %354 = vmatpush3.msra.mxu1 %v185_v21  ;;  %v174_v32 = vld [vmem:[#allocation4 + $0x8] sm:$0xff]  ;;  %v173_v33 = vld [vmem:[#allocation4] sm:$0xff] }
  0x27   :  { %323 = vmatpush3.msra.mxu0 %v73_v8  ;;  %355 = vmatprep.subr.mxu1 %v184_v22  ;;  %v275_v34 = vld [vmem:[%s494_s2] ss:$0 sm:$0xff] }
  0x28   :  { %324 = vmatprep.subr.mxu0 %v72_v10  ;;  %356 = vmatpush3.msra.mxu1 %v184_v22  ;;  %v274_v49 = vld [vmem:[%s496_s4] ss:$0 sm:$0xff] }
  0x29   :  { %325 = vmatpush3.msra.mxu0 %v72_v10  ;;  %357 = vmatprep.subr.mxu1 %v183_v23 }
  0x2a   :  { %326 = vmatprep.subr.mxu0 %v71_v11  ;;  %358 = vmatpush3.msra.mxu1 %v183_v23 }
  0x2b   :  { %327 = vmatpush3.msra.mxu0 %v71_v11  ;;  %359 = vmatprep.subr.mxu1 %v182_v24 }
  0x2c   :  { %328 = vmatprep.subr.mxu0 %v70_v12  ;;  %360 = vmatpush3.msra.mxu1 %v182_v24 }
  0x2d   :  { %329 = vmatpush3.msra.mxu0 %v70_v12  ;;  %361 = vmatprep.subr.mxu1 %v181_v25 }
  0x2e   :  { %330 = vmatprep.subr.mxu0 %v69_v13  ;;  %362 = vmatpush3.msra.mxu1 %v181_v25 }
  0x2f   :  { %331 = vmatpush3.msra.mxu0 %v69_v13  ;;  %363 = vmatprep.subr.mxu1 %v180_v26 }
  0x30   :  { %332 = vmatprep.subr.mxu0 %v68_v14  ;;  %364 = vmatpush3.msra.mxu1 %v180_v26 }
  0x31   :  { %333 = vmatpush3.msra.mxu0 %v68_v14  ;;  %365 = vmatprep.subr.mxu1 %v179_v27 }
  0x32   :  { %334 = vmatprep.subr.mxu0 %v67_v15  ;;  %366 = vmatpush3.msra.mxu1 %v179_v27 }
  0x33   :  { %335 = vmatpush3.msra.mxu0 %v67_v15  ;;  %367 = vmatprep.subr.mxu1 %v178_v28 }
  0x34   :  { %336 = vmatprep.subr.mxu0 %v66_v16  ;;  %368 = vmatpush3.msra.mxu1 %v178_v28 }
  0x35   :  { %337 = vmatpush3.msra.mxu0 %v66_v16  ;;  %369 = vmatprep.subr.mxu1 %v177_v29 }
  0x36   :  { %338 = vmatprep.subr.mxu0 %v65_v17  ;;  %370 = vmatpush3.msra.mxu1 %v177_v29 }
  0x37   :  { %339 = vmatpush3.msra.mxu0 %v65_v17  ;;  %371 = vmatprep.subr.mxu1 %v176_v30 }
  0x38   :  { %340 = vmatprep.subr.mxu0 %v64_v18  ;;  %372 = vmatpush3.msra.mxu1 %v176_v30 }
  0x39   :  { %341 = vmatpush3.msra.mxu0 %v64_v18  ;;  %373 = vmatprep.subr.mxu1 %v175_v31 }
  0x3a   :  { %342 = vmatprep.subr.mxu0 %v63_v19  ;;  %374 = vmatpush3.msra.mxu1 %v175_v31 }
  0x3b   :  { %343 = vmatpush3.msra.mxu0 %v63_v19  ;;  %375 = vmatprep.subr.mxu1 %v174_v32 }
  0x3c   :  { %345 = vmatmul.mubr.f32.vlgmr.msra.gmra.mxu0 %v62_v20  ;;  %376 = vmatpush3.msra.mxu1 %v174_v32 }
  0x3d   :  { %377 = vmatprep.subr.mxu1 %v173_v33 }
  0x3e   :  { %378 = vmatpush3.msra.mxu1 %v173_v33 }
  0xfc   :  { %v346_v35 = vpop.f32.mrf.mxu0 }
  0xfd   :  { %v158_v36 = vadd.f32 %v346_v35, %v275_v34 }
  0xfe   :  { %v152_v37 = vpop.f32.mrf.mxu0 }
  0xff   :  { %v164_v38 = vmul.f32 0.70710677, %v158_v36  ;;  %v153_v39 = vadd.f32 %v275_v34, %v152_v37  ;;  %v162_v46 = vmul.f32 0.5, %v158_v36 }
 0x101   :  { %386 = verf.f32 %v164_v38  ;;  %v163_v40 = vmul.f32 0.70710677, %v153_v39  ;;  %v161_v44 = vmul.f32 0.5, %v153_v39 }
 0x103   :  { %388 = verf.f32 %v163_v40 }
 0x10e   :  { %v387_v41 = vpop.eup %386 }
 0x10f   :  { %v168_v43 = vadd.f32 1.0, %v387_v41 }
 0x110   :  { %v389_v42 = vpop.eup %388 }
 0x111   :  { %v167_v45 = vadd.f32 1.0, %v389_v42  ;;  %v170_v48 = vmul.f32 %v168_v43, %v162_v46 }
 0x113   :  { %v169_v47 = vmul.f32 %v167_v45, %v161_v44 }
 0x115   :  { %379 = vmatprep.mubr.f32.mxu1 %v169_v47 }
 0x116   :  { %380 = vmatmul.mubr.f32.vlgmr.msra.gmra.mxu1 %v170_v48 }
 0x1d6   :  { %v381_v50 = vpop.f32.mrf.mxu1 }
 0x1d7   :  { %v265_v51 = vadd.f32 %v381_v50, %v274_v49 }
 0x1d8   :  { %v255_v52 = vpop.f32.mrf.mxu1 }
 0x1d9   :  { %267 = vst [vmem:[%s497_s5 + $0x8] sm:$0xff] %v265_v51  ;;  %v264_v53 = vadd.f32 %v274_v49, %v255_v52 }
 0x1db   :  { %266 = vst [vmem:[%s497_s5] sm:$0xff] %v264_v53 }
 0x1dc   :  { %272 = vsyncpa [#allocation3], 1 }
 0x1dd   :  { %273 = vsyncpa [#allocation5], 1 }

</bundles_post_ra>
